<compile_context>
chip_gen: v7x
topology: tpu7x:2x2x1
jax: 0.10.0
libtpu: 0.0.40
codegen_flags: <defaults>
</compile_context>

<pallas_src>
import math

import jax
import jax.numpy as jnp
from jax.experimental import pallas as pl
from jax.experimental.pallas import tpu as pltpu


DEFAULT_COMPUTE_DTYPE = jnp.bfloat16


def _round_up(x, m):
    return ((x + m - 1) // m) * m


def _vmem_capacity_bytes():
    """Physical VMEM per core; conservative 64 MiB (v7x) if the query fails."""
    try:
        info = pltpu.get_tpu_info()
        cap = getattr(info, "vmem_capacity_bytes", None)
        if cap:
            return int(cap)
    except Exception:
        pass
    return 64 << 20


def _sigmoid_f32(h):
    # Stable sigmoid via the EUP tanh: no exp overflow for large |h|,
    # no VALU division / Newton-refinement temps.
    return 0.5 * jnp.tanh(0.5 * h) + 0.5


# ---------------------------------------------------------------------------
# Kernels
# ---------------------------------------------------------------------------
def _sae_kernel_resident(x_ref, w1_ref, b1_ref, w2_ref, b2_ref, o_ref):
    """Weights fully resident (constant block index): fused single pass."""
    h = jnp.dot(x_ref[...], w1_ref[...], preferred_element_type=jnp.float32)
    h = _sigmoid_f32(h + b1_ref[...])
    y = jnp.dot(h.astype(w2_ref.dtype), w2_ref[...],
                preferred_element_type=jnp.float32)
    o_ref[...] = (y + b2_ref[...]).astype(o_ref.dtype)


def _sae_kernel_streamed_inplace(x_ref, w1_ref, b1_ref, w2_ref, b2_ref, o_ref):
    """Latent-tiled, f32 output: accumulate directly into the resident output
    block (its block index is constant across the latent axis)."""
    j = pl.program_id(1)
    h = jnp.dot(x_ref[...], w1_ref[...], preferred_element_type=jnp.float32)
    h = _sigmoid_f32(h + b1_ref[...])
    part = jnp.dot(h.astype(w2_ref.dtype), w2_ref[...],
                   preferred_element_type=jnp.float32)

    @pl.when(j == 0)
    def _():
        o_ref[...] = part + b2_ref[...]

    @pl.when(j != 0)
    def _():
        o_ref[...] += part


def _sae_kernel_streamed_scratch(x_ref, w1_ref, b1_ref, w2_ref, b2_ref, o_ref,
                                 acc_ref):
    """Latent-tiled, non-f32 output: f32 scratch accumulator + final cast."""
    j = pl.program_id(1)
    h = jnp.dot(x_ref[...], w1_ref[...], preferred_element_type=jnp.float32)
    h = _sigmoid_f32(h + b1_ref[...])
    part = jnp.dot(h.astype(w2_ref.dtype), w2_ref[...],
                   preferred_element_type=jnp.float32)

    @pl.when(j == 0)
    def _():
        acc_ref[...] = part + b2_ref[...]

    @pl.when(j != 0)
    def _():
        acc_ref[...] += part

    @pl.when(j == pl.num_programs(1) - 1)
    def _():
        o_ref[...] = acc_ref[...].astype(o_ref.dtype)


# ---------------------------------------------------------------------------
# Tile planning
# ---------------------------------------------------------------------------
def _plan(B, size, n_latent, cdtype, out_dtype, bm_req, tl_req):
    """Pick (bm, tl) under the chip VMEM budget.

    Returns (bm, tl, Bp, Lp, resident, out_inplace, vmem_limit_bytes)."""
    cap = _vmem_capacity_bytes()
    budget = int(cap * 0.80)                         # headroom for compiler temps
    csz = jnp.dtype(cdtype).itemsize
    osz = jnp.dtype(out_dtype).itemsize
    out_inplace = jnp.dtype(out_dtype) == jnp.dtype(jnp.float32)
    bias_bytes = 2 * 2 * (n_latent + size) * 4       # b1/b2, 2 buffers, f32

    # Residency: double-buffered W1+W2 must leave >= half the budget for tiles.
    w_resident_bytes = 2 * 2 * size * n_latent * csz
    if tl_req is not None:
        resident = tl_req >= n_latent
    else:
        resident = w_resident_bytes <= budget // 2

    # --- batch tile --------------------------------------------------------
    Bp8 = _round_up(B, 8)
    bm = 512 if bm_req is None else max(8, _round_up(bm_req, 8))
    bm = min(bm, Bp8)
    if bm_req is None and Bp8 > 8:
        # keep >= 2 batch tiles so dual-TensorCore chips use both cores,
        # unless that would tank the streamed-weight arithmetic intensity.
        half = _round_up(max(8, (B + 1) // 2), 8)
        if resident or half >= 256:
            bm = min(bm, half)

    if resident:
        tl = Lp = n_latent
        per_row = 2 * size * csz + 2 * size * osz + n_latent * (4 + csz)
        avail = budget - w_resident_bytes - bias_bytes
        while bm > 8 and bm * per_row > avail:
            bm = max(8, _round_up(bm // 2, 8))
        total = w_resident_bytes + bias_bytes + bm * per_row
    else:
        def fixed_bytes(bm_):
            out_b = (2 * bm_ * size * 4) if out_inplace else (
                2 * bm_ * size * osz + bm_ * size * 4)
            return 2 * bm_ * size * csz + out_b + bias_bytes

        def per_tl_bytes(bm_):
            # W1 + W2 slabs (double-buffered) + h / h-cast intermediates
            return 4 * size * csz + bm_ * (4 + csz) + 16

        while bm > 64 and budget - fixed_bytes(bm) < 128 * per_tl_bytes(bm):
            bm = max(64, _round_up(bm // 2, 8))

        avail = max(0, budget - fixed_bytes(bm))
        tl_max = max(128, (avail // per_tl_bytes(bm)) // 128 * 128)
        if tl_req is None:
            tl = tl_max
        else:
            tl = min(_round_up(max(tl_req, 128), 128), tl_max)
        if tl >= n_latent:
            # streaming not actually needed at this bm -> go resident
            return _plan(B, size, n_latent, cdtype, out_dtype, bm, n_latent)
        Lp = _round_up(n_latent, tl)
        total = fixed_bytes(bm) + tl * per_tl_bytes(bm)

    Bp = _round_up(B, bm)
    vmem_limit = int(min(cap, max(32 << 20, int(total * 1.3) + (2 << 20))))
    return bm, tl, Bp, Lp, resident, out_inplace, vmem_limit


# ---------------------------------------------------------------------------
# pallas_call wrapper
# ---------------------------------------------------------------------------
def _sae_pallas_call(xp, w1p, b1p, w2p, b2p, *, bm, tl, out_dtype, vmem_limit,
                     resident, out_inplace, n_latent_logical, B_logical):
    Bp, size = xp.shape
    Lp = w1p.shape[1]
    csz = xp.dtype.itemsize
    n_batch_tiles = Bp // bm

    w_bytes = 2 * size * Lp * csz
    cost = pl.CostEstimate(
        flops=int(4 * B_logical * size * n_latent_logical),
        transcendentals=int(B_logical * n_latent_logical),
        bytes_accessed=int(Bp * size * csz
                           + w_bytes * (1 if resident else n_batch_tiles)
                           + (Lp + size) * 4
                           + Bp * size * jnp.dtype(out_dtype).itemsize),
    )

    if resident:
        grid = (n_batch_tiles,)
        in_specs = [
            pl.BlockSpec((bm, size), lambda i: (i, 0)),    # x tile
            pl.BlockSpec((size, Lp), lambda i: (0, 0)),    # W1 (resident)
            pl.BlockSpec((1, Lp), lambda i: (0, 0)),       # b1
            pl.BlockSpec((Lp, size), lambda i: (0, 0)),    # W2 (resident)
            pl.BlockSpec((1, size), lambda i: (0, 0)),     # b2
        ]
        out_specs = pl.BlockSpec((bm, size), lambda i: (i, 0))
        scratch_shapes = ()
        kernel = _sae_kernel_resident
        dim_sem = ("parallel",)
    else:
        grid = (n_batch_tiles, Lp // tl)
        in_specs = [
            pl.BlockSpec((bm, size), lambda i, j: (i, 0)),   # x tile
            pl.BlockSpec((size, tl), lambda i, j: (0, j)),   # W1 column slab
            pl.BlockSpec((1, tl), lambda i, j: (0, j)),      # b1 slab
            pl.BlockSpec((tl, size), lambda i, j: (j, 0)),   # W2 row slab
            pl.BlockSpec((1, size), lambda i, j: (0, 0)),    # b2
        ]
        out_specs = pl.BlockSpec((bm, size), lambda i, j: (i, 0))
        if out_inplace:
            kernel = _sae_kernel_streamed_inplace
            scratch_shapes = ()
        else:
            kernel = _sae_kernel_streamed_scratch
            scratch_shapes = (pltpu.VMEM((bm, size), jnp.float32),)
        dim_sem = ("parallel", "arbitrary")

    return pl.pallas_call(
        kernel,
        out_shape=jax.ShapeDtypeStruct((Bp, size), out_dtype),
        grid_spec=pltpu.PrefetchScalarGridSpec(
            num_scalar_prefetch=0,
            grid=grid,
            in_specs=in_specs,
            out_specs=out_specs,
            scratch_shapes=scratch_shapes,
        ),
        compiler_params=pltpu.CompilerParams(
            dimension_semantics=dim_sem,
            vmem_limit_bytes=vmem_limit,
        ),
        cost_estimate=cost,
    )(xp, w1p, b1p, w2p, b2p)


# ---------------------------------------------------------------------------
# Public API
# ---------------------------------------------------------------------------
def prepare_sae_params(w1, b1, w2, b2, *, Lp, compute_dtype):
    """Pad the latent dim to Lp and cast weights to the MXU compute dtype.
    Do this ONCE (outside the step function), not per forward."""
    n_latent = w1.shape[1]
    cd = jnp.dtype(compute_dtype)
    if Lp != n_latent:
        w1 = jnp.pad(w1, ((0, 0), (0, Lp - n_latent)))
        b1 = jnp.pad(b1, ((0, Lp - n_latent),))
        w2 = jnp.pad(w2, ((0, Lp - n_latent), (0, 0)))
    w1p = w1.astype(cd)
    w2p = w2.astype(cd)
    b1p = b1.reshape(1, -1).astype(jnp.float32)
    b2p = b2.reshape(1, -1).astype(jnp.float32)
    return w1p, b1p, w2p, b2p


def make_sae_forward(w1, b1, w2, b2, *, bm=None, tl=None,
                     compute_dtype=DEFAULT_COMPUTE_DTYPE,
                     out_dtype=jnp.float32):
    """Pre-pad / pre-cast the weights once and return a jitted forward(x)."""
    size, n_latent = w1.shape
    cdtype = jnp.dtype(compute_dtype)
    odtype = jnp.dtype(out_dtype)

    # Pick the latent tiling once (nominal large batch) so the weight
    # preparation can be hoisted off the per-step critical path.
    _, tl0, _, Lp, resident0, _, _ = _plan(4096, size, n_latent, cdtype,
                                           odtype, bm, tl)
    w1p, b1p, w2p, b2p = prepare_sae_params(w1, b1, w2, b2, Lp=Lp,
                                            compute_dtype=cdtype)
    tl_pin = n_latent if resident0 else tl0

    @jax.jit
    def _fwd(x, w1p, b1p, w2p, b2p):
        B = x.shape[0]
        bm_, tl_, Bp, _, resident, out_inplace, vmem_limit = _plan(
            B, size, n_latent, cdtype, odtype, bm, tl_pin)
        if not resident:
            tl_ = tl0                      # guaranteed divisor of padded Lp
        xp = x.astype(cdtype)
        if Bp != B:
            xp = jnp.pad(xp, ((0, Bp - B), (0, 0)))
        out = _sae_pallas_call(xp, w1p, b1p, w2p, b2p, bm=bm_, tl=tl_,
                               out_dtype=odtype, vmem_limit=vmem_limit,
                               resident=resident, out_inplace=out_inplace,
                               n_latent_logical=n_latent, B_logical=B)
        return out[:B] if Bp != B else out

    def forward(x):
        return _fwd(x, w1p, b1p, w2p, b2p)

    return forward


def sae_forward(x, w1, b1, w2, b2, *, bm=None, tl=None,
                compute_dtype=DEFAULT_COMPUTE_DTYPE, out_dtype=None):
    """One-shot convenience wrapper.  For repeated use prefer
    make_sae_forward(), which hoists the weight pad/cast off the hot path."""
    out_dtype = jnp.dtype(out_dtype) if out_dtype is not None else x.dtype
    B, size = x.shape
    n_latent = w1.shape[1]
    cdtype = jnp.dtype(compute_dtype)

    bm_, tl_, Bp, Lp, resident, out_inplace, vmem_limit = _plan(
        B, size, n_latent, cdtype, out_dtype, bm, tl)
    w1p, b1p, w2p, b2p = prepare_sae_params(w1, b1, w2, b2, Lp=Lp,
                                            compute_dtype=cdtype)
    xp = x.astype(cdtype)
    if Bp != B:
        xp = jnp.pad(xp, ((0, Bp - B), (0, 0)))
    out = _sae_pallas_call(xp, w1p, b1p, w2p, b2p, bm=bm_, tl=tl_,
                           out_dtype=out_dtype, vmem_limit=vmem_limit,
                           resident=resident, out_inplace=out_inplace,
                           n_latent_logical=n_latent, B_logical=B)
    return out[:B] if Bp != B else out


def init_sae_params(key, size, n_latent, dtype=jnp.float32):
    """PyTorch nn.Linear default init (U(+/-1/sqrt(fan_in)) for W and b);
    weights stored as [in, out] (transposed vs torch's [out, in])."""
    k1, k2, k3, k4 = jax.random.split(key, 4)
    bound1 = 1.0 / math.sqrt(size)
    bound2 = 1.0 / math.sqrt(n_latent)
    w1 = jax.random.uniform(k1, (size, n_latent), dtype, -bound1, bound1)
    b1 = jax.random.uniform(k2, (n_latent,), dtype, -bound1, bound1)
    w2 = jax.random.uniform(k3, (n_latent, size), dtype, -bound2, bound2)
    b2 = jax.random.uniform(k4, (size,), dtype, -bound2, bound2)
    return w1, b1, w2, b2


def sae_reference(x, w1, b1, w2, b2):
    h = jax.nn.sigmoid(x.astype(jnp.float32) @ w1.astype(jnp.float32) + b1)
    return h @ w2.astype(jnp.float32) + b2


if __name__ == "__main__":
    key = jax.random.PRNGKey(0)
    kx, kp, kx2, kp2 = jax.random.split(key, 4)

    # --- test 1: toy shapes, f32 MXU path, resident weights (tight tol) ----
    B, size, n_latent = 8, 32, 16
    x = jax.random.normal(kx, (B, size), jnp.float32)
    w1, b1, w2, b2 = init_sae_params(kp, size, n_latent)

    out = jax.block_until_ready(
        sae_forward(x, w1, b1, w2, b2, compute_dtype=jnp.float32))
    ref = sae_reference(x, w1, b1, w2, b2)
    assert out.shape == (B, size)
    assert jnp.allclose(out, ref, atol=1e-5, rtol=1e-5), "mismatch (f32 resident)"

    # --- test 2: ragged batch, streamed latent tiles, default bf16 MXU path,
    #             prepared-weights closure (f32 out -> in-place accumulation)
    B2, size2, n_latent2 = 100, 128, 320
    x2 = jax.random.normal(kx2, (B2, size2), jnp.float32)
    w1b, b1b, w2b, b2b = init_sae_params(kp2, size2, n_latent2)

    fwd = make_sae_forward(w1b, b1b, w2b, b2b, bm=32, tl=128)
    out2 = jax.block_until_ready(fwd(x2))
    ref2 = sae_reference(x2, w1b, b1b, w2b, b2b)
    assert out2.shape == (B2, size2)
    assert jnp.allclose(out2, ref2, atol=5e-2, rtol=5e-2), "mismatch (bf16 streamed)"

    # --- test 3: bf16 in/out -> streamed scratch-accumulator path ----------
    x3 = x2.astype(jnp.bfloat16)
    out3 = jax.block_until_ready(sae_forward(x3, w1b, b1b, w2b, b2b,
                                             bm=32, tl=128))
    assert out3.dtype == jnp.bfloat16 and out3.shape == (B2, size2)
    assert jnp.allclose(out3.astype(jnp.float32), ref2, atol=1e-1, rtol=1e-1), \
        "mismatch (bf16 scratch)"

    # --- test 4: fully-default path (bf16 compute, resident, >=2 batch tiles)
    out4 = jax.block_until_ready(sae_forward(x2, w1b, b1b, w2b, b2b))
    assert jnp.allclose(out4, ref2, atol=5e-2, rtol=5e-2), "mismatch (default)"

    print("KERNEL_OK")
</pallas_src>

<mosaic_0001>
module attributes {stable_mosaic.version = 11 : i64} {
  func.func @_sae_kernel_resident(%arg0: i32, %arg1: memref<8x32xf32, #tpu.memory_space<vmem>>, %arg2: memref<32x16xf32, #tpu.memory_space<vmem>>, %arg3: memref<1x16xf32, #tpu.memory_space<vmem>>, %arg4: memref<16x32xf32, #tpu.memory_space<vmem>>, %arg5: memref<1x32xf32, #tpu.memory_space<vmem>>, %arg6: memref<8x32xf32, #tpu.memory_space<vmem>>) attributes {dimension_semantics = [#tpu.dimension_semantics<parallel>], iteration_bounds = array<i64: 1>, scalar_prefetch = 0 : i64, scratch_operands = 0 : i64, tpu.core_type = #tpu.core_type<tc>, window_params = [{transform_indices = @transform_0, window_bounds = array<i64: 8, 32>}, {pipeline_mode = #tpu.pipeline_mode<synchronous>, transform_indices = @transform_1, window_bounds = array<i64: 32, 16>}, {pipeline_mode = #tpu.pipeline_mode<synchronous>, transform_indices = @transform_2, window_bounds = array<i64: 1, 16>}, {pipeline_mode = #tpu.pipeline_mode<synchronous>, transform_indices = @transform_3, window_bounds = array<i64: 16, 32>}, {pipeline_mode = #tpu.pipeline_mode<synchronous>, transform_indices = @transform_4, window_bounds = array<i64: 1, 32>}, {transform_indices = @transform_5, window_bounds = array<i64: 8, 32>}]} {
    %c0 = arith.constant 0 : index
    %c0_0 = arith.constant 0 : index
    %0 = vector.load %arg1[%c0, %c0_0] : memref<8x32xf32, #tpu.memory_space<vmem>>, vector<8x32xf32>
    %c0_1 = arith.constant 0 : index
    %c0_2 = arith.constant 0 : index
    %1 = vector.load %arg2[%c0_1, %c0_2] : memref<32x16xf32, #tpu.memory_space<vmem>>, vector<32x16xf32>
    %cst = arith.constant dense<0.000000e+00> : vector<8x16xf32>
    %2 = tpu.matmul %0, %1, %cst {dimension_numbers = #tpu.dot_dimension_numbers<[1], [0], [0], [1], [0, 0, 1, 1], [], []>} : vector<8x32xf32>, vector<32x16xf32>, vector<8x16xf32> -> vector<8x16xf32>
    %c0_3 = arith.constant 0 : index
    %c0_4 = arith.constant 0 : index
    %3 = vector.load %arg3[%c0_3, %c0_4] : memref<1x16xf32, #tpu.memory_space<vmem>>, vector<1x16xf32>
    %4 = vector.broadcast %3 : vector<1x16xf32> to vector<8x16xf32>
    %5 = arith.addf %2, %4 : vector<8x16xf32>
    %cst_5 = arith.constant 5.000000e-01 : f32
    %6 = vector.broadcast %cst_5 : f32 to vector<8x16xf32>
    %7 = arith.mulf %6, %5 : vector<8x16xf32>
    %8 = math.tanh %7 : vector<8x16xf32>
    %cst_6 = arith.constant 5.000000e-01 : f32
    %9 = vector.broadcast %cst_6 : f32 to vector<8x16xf32>
    %10 = arith.mulf %9, %8 : vector<8x16xf32>
    %cst_7 = arith.constant 5.000000e-01 : f32
    %11 = vector.broadcast %cst_7 : f32 to vector<8x16xf32>
    %12 = arith.addf %10, %11 : vector<8x16xf32>
    %c0_8 = arith.constant 0 : index
    %c0_9 = arith.constant 0 : index
    %13 = vector.load %arg4[%c0_8, %c0_9] : memref<16x32xf32, #tpu.memory_space<vmem>>, vector<16x32xf32>
    %cst_10 = arith.constant dense<0.000000e+00> : vector<8x32xf32>
    %14 = tpu.matmul %12, %13, %cst_10 {dimension_numbers = #tpu.dot_dimension_numbers<[1], [0], [0], [1], [0, 0, 1, 1], [], []>} : vector<8x16xf32>, vector<16x32xf32>, vector<8x32xf32> -> vector<8x32xf32>
    %c0_11 = arith.constant 0 : index
    %c0_12 = arith.constant 0 : index
    %15 = vector.load %arg5[%c0_11, %c0_12] : memref<1x32xf32, #tpu.memory_space<vmem>>, vector<1x32xf32>
    %16 = vector.broadcast %15 : vector<1x32xf32> to vector<8x32xf32>
    %17 = arith.addf %14, %16 : vector<8x32xf32>
    %c0_13 = arith.constant 0 : index
    %c0_14 = arith.constant 0 : index
    %18 = vector.load %arg6[%c0_13, %c0_14] : memref<8x32xf32, #tpu.memory_space<vmem>>, vector<8x32xf32>
    tpu.vector_store %arg6[%c0_13, %c0_14], %17 {strides = array<i32>} : memref<8x32xf32, #tpu.memory_space<vmem>>, vector<8x32xf32>,
    return
  }
  func.func @transform_0(%arg0: i32) -> (i32, i32) {
    %c0_i32 = arith.constant 0 : i32
    %c0_i32_0 = arith.constant 0 : i32
    return %arg0, %c0_i32 : i32, i32
  }
  func.func @transform_1(%arg0: i32) -> (i32, i32) {
    %c0_i32 = arith.constant 0 : i32
    %c0_i32_0 = arith.constant 0 : i32
    %c0_i32_1 = arith.constant 0 : i32
    return %c0_i32, %c0_i32_0 : i32, i32
  }
  func.func @transform_2(%arg0: i32) -> (i32, i32) {
    %c0_i32 = arith.constant 0 : i32
    %c0_i32_0 = arith.constant 0 : i32
    %c0_i32_1 = arith.constant 0 : i32
    return %c0_i32, %c0_i32_0 : i32, i32
  }
  func.func @transform_3(%arg0: i32) -> (i32, i32) {
    %c0_i32 = arith.constant 0 : i32
    %c0_i32_0 = arith.constant 0 : i32
    %c0_i32_1 = arith.constant 0 : i32
    return %c0_i32, %c0_i32_0 : i32, i32
  }
  func.func @transform_4(%arg0: i32) -> (i32, i32) {
    %c0_i32 = arith.constant 0 : i32
    %c0_i32_0 = arith.constant 0 : i32
    %c0_i32_1 = arith.constant 0 : i32
    return %c0_i32, %c0_i32_0 : i32, i32
  }
  func.func @transform_5(%arg0: i32) -> (i32, i32) {
    %c0_i32 = arith.constant 0 : i32
    %c0_i32_0 = arith.constant 0 : i32
    return %arg0, %c0_i32 : i32, i32
  }
}

</mosaic_0001>

<bundles_post_ra>
// kernel: tpu_custom_call.1
= control target key start
LH: loop header
LB: loop body
LE: loop exit
PB: predicated region body
PF: predicated region fallthrough
CT: control target
= control target key end

     0   :  { %v278_v3 = vmov 0.0|0.0   ;;  %vm279_vm0 = vmmov 0   ;;  %v280_v6 = vmov 0.0   ;;  %s353_s0 = inlined_call_operand.vmem [shape: f32[8,32], index: 0, kind: input, shape index: {}]   ;;  %s354_s1 = inlined_call_operand.vmem [shape: f32[32,16], index: 1, kind: input, shape index: {}]   ;;  %s355_s2 = inlined_call_operand.vmem [shape: f32[1,16], index: 2, kind: input, shape index: {}]   ;;  %s356_s3 = inlined_call_operand.vmem [shape: f32[16,32], index: 3, kind: input, shape index: {}]   ;;  %s357_s4 = inlined_call_operand.vmem [shape: f32[1,32], index: 4, kind: input, shape index: {}]   ;;  %s358_s5 = inlined_call_operand.hbm [shape: f32[8,32], index: 5, kind: output, shape index: {}]  }
   0x1   :  { %v22_v0 = vld [vmem:[%s354_s1] sm:$0xff]  ;;  %v23_v1 = vld [vmem:[%s354_s1 + $0x8] sm:$0xff]  ;;  %v24_v2 = vld [vmem:[%s354_s1 + $0x10] sm:$0xff]  ;;  %239 = vmatprep.subr.bf16.mxu0 %v278_v3  ;;  %229 = vmatprep.mubr.msk.f32.mxu0 %vm279_vm0, %v280_v6 }
   0x2   :  { %v240_v4 = vpack.c.bf16 %v23_v1, %v22_v0  ;;  %v25_v5 = vld [vmem:[%s354_s1 + $0x18] sm:$0xff]  ;;  %245 = vmatprep.subr.bf16.mxu1 %v278_v3  ;;  %236 = vmatprep.mubr.msk.f32.mxu1 %vm279_vm0, %v280_v6 }
   0x3   :  { %10 = vsyncpa [#allocation3], 0  ;;  %v243_v7 = vpack.c.bf16 %v25_v5, %v24_v2  ;;  %v21_v8 = vld [vmem:[%s353_s0] sm:$0xff]  ;;  %vm33_vm1 = vcmask 261120   ;;  %v112_v10 = vld [vmem:[%s356_s3 + $0x8] sm:$0xff]  ;;  %vm120_vm2 = vcmask 130048  }
   0x4   :  { %241 = vmatpush3.bf16.msra.mxu0 %v240_v4  ;;  %v111_v9 = vld [vmem:[%s356_s3] sm:$0xff]  ;;  %s281_s3 = smov [#allocation2]  }
   0x5   :  { %242 = vmatprep.subr.bf16.mxu0 %v278_v3  ;;  %v246_v11 = vpack.c.bf16 %v112_v10, %v111_v9  ;;  %v209_v12 = vld [vmem:[%s355_s2] ss:$0 sm:$0xff]  ;;  %s201_s9 = sshll.u32 %s281_s3, 4  ;;  %s202_s9 = int_to_ptr.vmem [resolvable:$true] %s201_s9 }
   0x6   :  { %v211_v20 = vld [vmem:[%s357_s4] ss:$0 sm:$0xff]  ;;  %s254_s2 = scalar_lea.vmem %s202_s9, 128  ;;  %p259_p1 = scmp.lt.s32.totalorder %s202_s9, %s202_s9 }
   0x7   :  { %247 = vmatpush3.bf16.msra.mxu1 %v246_v11  ;;  %p255_p0 = scmp.ne.s32.totalorder %s202_s9, %s254_s2  ;;  %p260_p2 = scmp.lt.s32.totalorder %s254_s2, %s254_s2 }
   0x8   :  { %244 = vmatpush3.bf16.msra.mxu0 %v243_v7 }
   0x9   :  { %p261_p3 = por %p260_p2, %p259_p1 }
   0xb   :  { %230 = vmatmul.mubr.msk.f32.vlgmr.msra.gmra.mrb[0].mxu0 %vm33_vm1, %v21_v8  ;;  %p262_p4 = pnand %p261_p3, %p255_p0 }
  0xde   :  { %v103_v13 = vpop.f32.mrb[0].mxu0 }
  0xdf   :  { %v104_v14 = vadd.f32 %v209_v12, %v103_v13  ;;  %v231_v15 = vpop.f32.mrb[1].mxu0 }
  0xe1   :  { %v107_v16 = vmul.f32 0.5, %v104_v14 }
  0xe3   :  { %252 = vtanh.f32 %v107_v16 }
  0xed   :  { %v253_v17 = vpop.eup %252 }
  0xee   :  { %v109_v18 = vmul.f32 0.5, %v253_v17 }
  0xf0   :  { %v110_v19 = vadd.f32 0.5, %v109_v18 }
  0xf2   :  { %237 = vmatmul.mubr.msk.f32.vlgmr.msra.gmra.mrb[0].mxu1 %vm120_vm2, %v110_v19 }
 0x1c5   :  { %v190_v21 = vpop.f32.mrb[0].mxu1 }
 0x1c6   :  { %v191_v22 = vadd.f32 %v211_v20, %v190_v21  ;;  %v238_v23 = vpop.f32.mrb[1].mxu1 }
 0x1c8   :  { %194 = vst.msk [vmem:[#allocation2] sm:$0xff] %vm33_vm1, %v191_v22 }
 0x1c9   :  { %265 = shalt.err (!%p262_p4)
}
 0x1ca   :  { %s266_s12 = scalar_lea.hbm %s358_s5, 128 }
 0x1cb   :  { %p267_p5 = scmp.ne.s32.totalorder %s358_s5, %s266_s12  ;;  %p270_p6 = scmp.lt.u32.totalorder %s266_s12, %s358_s5 }
 0x1cd   :  { %p272_p7 = pnand %p270_p6, %p267_p5 }
 0x1cf   :  { %275 = shalt.err (!%p272_p7)
}
 0x1d0   :  { %204 = dma.vmem_to_hbm [thread:$0]  %s202_s9, 128, %s358_s5, [#allocation3]  }
 0x1d1   :  { %276 = dma.done.wait [#allocation3], 128  }
 0x1d2   :  { %277 = vsyncadd [#allocation3], 4294967168 }
 0x1d3   :  { %208 = vsyncpa [#allocation3], 1 }

</bundles_post_ra>
